<compile_context>
chip_gen: v7x
topology: tpu7x:2x2x1
jax: 0.10.0
libtpu: 0.0.40
codegen_flags: <defaults>
</compile_context>

<pallas_src>
import jax
import jax.numpy as jnp
import numpy as np
from jax.experimental import pallas as pl
from jax.experimental.pallas import tpu as pltpu


_LANES = 512            # widest lane-dense tile width tried (multiple of 128)
_BLOCK_ROWS = 1024      # row tile cap: (1024, 512) f32 = 2 MiB per buffer
_MIN_PALLAS_ELEMS = 4096  # below this, plain jnp beats a kernel launch


def _affine_kernel(p_ref, x_ref, o_ref):
    """One (tm, L) tile of interleaved [x0, y0, x1, y1, ...] coordinates."""
    # p_ref: SMEM f32[4] = [cos(theta), sin(theta), trans_x, trans_y]
    c = p_ref[0]
    s = p_ref[1]
    tx = p_ref[2]
    ty = p_ref[3]

    v = x_ref[...].astype(jnp.float32)              # (tm, L), lane-dense
    n_lanes = v.shape[-1]

    # Even lanes hold x-coordinates, odd lanes hold y-coordinates.  The
    # parity mask / per-lane constants are built as a single (1, L) row and
    # broadcast (the kernel is HBM-bound; VPU/XLU have slack).
    lane = jax.lax.broadcasted_iota(jnp.int32, (1, n_lanes), 1)
    is_x = (lane & 1) == 0                          # (1, L)

    # Partner coordinate of the same point: lane j+1 for even j, j-1 for odd.
    # (Circular wrap-around lanes are never selected by the parity mask;
    #  pairs never straddle a row because n_lanes is even.)
    nxt = pltpu.roll(v, shift=n_lanes - 1, axis=1)  # nxt[:, j] = v[:, j+1]
    prv = pltpu.roll(v, shift=1, axis=1)            # prv[:, j] = v[:, j-1]
    partner = jnp.where(is_x, nxt, prv)

    # x @ rot.T with rot = [[c, -s], [s, c]]:
    #   out_x = c*X - s*Y + tx   (even lanes, partner = Y)
    #   out_y = s*X + c*Y + ty   (odd lanes,  partner = X)
    s_signed = jnp.where(is_x, -s, s)               # (1, L)
    t = jnp.where(is_x, tx, ty)                     # (1, L)
    o_ref[...] = (c * v + s_signed * partner + t).astype(o_ref.dtype)


def _round_up(a, b):
    return ((a + b - 1) // b) * b


def affine_forward(x, theta, trans, *, block_rows=_BLOCK_ROWS, lanes=_LANES,
                   min_pallas_elems=_MIN_PALLAS_ELEMS, in_place=False):
    """Pallas equivalent of Affine.forward for x of shape (..., 2)."""
    x = jnp.asarray(x)
    if x.shape[-1] != 2:
        raise ValueError(f"expected trailing dim of size 2, got {x.shape}")
    if lanes % 128 != 0 or lanes % 2 != 0:
        raise ValueError("lanes must be an even multiple of 128")
    orig_shape = x.shape
    out_dtype = x.dtype

    # Scalar parameter setup (glue).
    theta = jnp.asarray(theta, dtype=jnp.float32)
    trans_flat = jnp.asarray(trans, dtype=jnp.float32).reshape(-1)   # (2,)
    c = jnp.cos(theta)
    s = jnp.sin(theta)

    def _jnp_affine(points):            # tiny epilogue / small-N fallback
        pf = points.astype(jnp.float32)
        rx = c * pf[..., 0] - s * pf[..., 1] + trans_flat[0]
        ry = s * pf[..., 0] + c * pf[..., 1] + trans_flat[1]
        return jnp.stack([rx, ry], axis=-1).astype(out_dtype)

    flat = x.reshape(-1)                # interleaved [x0, y0, x1, y1, ...]
    n = flat.shape[0]

    # Small-N fallback: a pallas_call launch is not worth a few vregs of work.
    if n < max(min_pallas_elems, lanes):
        return _jnp_affine(x)

    # Prefer a lane width that divides n exactly -> fully zero-copy path.
    eff_lanes = lanes
    for cand in (lanes, 384, 256, 128):
        if cand <= lanes and cand % 128 == 0 and n % cand == 0:
            eff_lanes = cand
            break

    n_aligned = (n // eff_lanes) * eff_lanes
    m = n_aligned // eff_lanes
    x2 = flat[:n_aligned].reshape(m, eff_lanes)     # free (row-major view)

    # Row tile: multiple of 8 (f32 sublane); once there are >= 16 rows,
    # guarantee >= 2 roughly-balanced grid steps so the "parallel" axis can
    # split across the two TensorCores on v7x (no-op on v5e/v6e).
    # TODO(synk): consider pltpu.CORE_PARALLEL / pl.core_map if plain
    # "parallel" does not shard across v7x TensorCores in practice.
    if m < 16:
        tm = m                                      # single full-extent block
    elif m <= block_rows:
        tm = min(_round_up(pl.cdiv(m, 2), 8), m)
    else:
        tm = block_rows
    grid = (pl.cdiv(m, tm),)                        # partial last block is OK

    itemsize = jnp.dtype(out_dtype).itemsize
    call_kwargs = dict(
        grid=grid,
        out_shape=jax.ShapeDtypeStruct((m, eff_lanes), out_dtype),
        in_specs=[
            pl.BlockSpec(memory_space=pltpu.MemorySpace.SMEM),   # f32[4]
            pl.BlockSpec((tm, eff_lanes), lambda i: (i, 0)),
        ],
        out_specs=pl.BlockSpec((tm, eff_lanes), lambda i: (i, 0)),
        compiler_params=pltpu.CompilerParams(
            dimension_semantics=("parallel",),
        ),
        cost_estimate=pl.CostEstimate(
            flops=4 * n_aligned,
            transcendentals=0,
            bytes_accessed=2 * n_aligned * itemsize,
        ),
    )
    if in_place:
        # Alias the coordinate slab to the output; a real win only when the
        # caller donates x at the jit boundary (otherwise XLA copies first).
        call_kwargs["input_output_aliases"] = {1: 0}

    params = jnp.stack([c, s, trans_flat[0], trans_flat[1]]).astype(jnp.float32)
    head = pl.pallas_call(_affine_kernel, **call_kwargs)(params, x2)

    out_flat = head.reshape(-1)                     # free (row-major view)
    if n_aligned < n:
        # < eff_lanes leftover interleaved coords: tiny jnp epilogue + one
        # concatenate (replaces the old pad + slice full-array HBM passes).
        tail_pts = flat[n_aligned:].reshape(-1, 2)
        out_flat = jnp.concatenate([out_flat, _jnp_affine(tail_pts).reshape(-1)])
    return out_flat.reshape(orig_shape)


def affine_reference(x, theta, trans):
    c, s = jnp.cos(jnp.float32(theta)), jnp.sin(jnp.float32(theta))
    rot = jnp.stack([jnp.stack([c, -s]), jnp.stack([s, c])]).astype(jnp.float32)
    return x @ rot.T + jnp.asarray(trans, jnp.float32).reshape(1, 2)


if __name__ == "__main__":
    key = jax.random.PRNGKey(0)
    k1, k2, k3, k4 = jax.random.split(key, 4)

    theta = jnp.float32(0.4)                        # module defaults
    trans = jnp.array([[0.0, 0.0]], dtype=jnp.float32)
    theta2 = jnp.float32(1.234)
    trans2 = jnp.array([[0.3, -0.7]], dtype=jnp.float32)

    # 1) Lane-aligned Pallas path, 2-step "parallel" grid (m=32 rows of 512).
    x1 = jax.random.normal(k1, (4, 2048, 2), dtype=jnp.float32)
    out1 = jax.block_until_ready(affine_forward(x1, theta, trans))
    np.testing.assert_allclose(np.asarray(out1),
                               np.asarray(affine_reference(x1, theta, trans)),
                               rtol=1e-5, atol=1e-5)

    # 2) Misaligned size: Pallas head on the aligned prefix (partial last
    #    row-block) + tiny jnp tail epilogue — no pad/slice passes.
    x2 = jax.random.normal(k2, (2, 9000, 2), dtype=jnp.float32)
    out2 = jax.block_until_ready(affine_forward(x2, theta2, trans2))
    np.testing.assert_allclose(np.asarray(out2),
                               np.asarray(affine_reference(x2, theta2, trans2)),
                               rtol=1e-5, atol=1e-5)

    # 3) Multi-step pipelined grid (8 steps) + in-place aliased output.
    x3 = jax.random.normal(k3, (8, 4100, 2), dtype=jnp.float32)
    out3 = jax.block_until_ready(
        affine_forward(x3, theta2, trans2, block_rows=16, in_place=True))
    np.testing.assert_allclose(np.asarray(out3),
                               np.asarray(affine_reference(x3, theta2, trans2)),
                               rtol=1e-5, atol=1e-5)

    # 4) Tiny input: plain-jnp fallback (no kernel launch overhead).
    x4 = jax.random.normal(k4, (2, 8, 2), dtype=jnp.float32)
    out4 = jax.block_until_ready(affine_forward(x4, theta, trans))
    np.testing.assert_allclose(np.asarray(out4),
                               np.asarray(affine_reference(x4, theta, trans)),
                               rtol=1e-5, atol=1e-5)

    print("KERNEL_OK")
</pallas_src>

<mosaic_0001>
module attributes {stable_mosaic.version = 11 : i64} {
  func.func @_affine_kernel(%arg0: i32, %arg1: memref<4xf32, #tpu.memory_space<smem>>, %arg2: memref<16x512xf32, #tpu.memory_space<vmem>>, %arg3: memref<16x512xf32, #tpu.memory_space<vmem>>) attributes {dimension_semantics = [#tpu.dimension_semantics<parallel>], iteration_bounds = array<i64: 2>, scalar_prefetch = 0 : i64, scratch_operands = 0 : i64, tpu.core_type = #tpu.core_type<tc>, window_params = [{transform_indices = @transform_0, window_bounds = array<i64: 4>}, {transform_indices = @transform_1, window_bounds = array<i64: 16, 512>}, {transform_indices = @transform_2, window_bounds = array<i64: 16, 512>}]} {
    %c0 = arith.constant 0 : index
    %0 = memref.load %arg1[%c0] : memref<4xf32, #tpu.memory_space<smem>>
    %c1 = arith.constant 1 : index
    %1 = memref.load %arg1[%c1] : memref<4xf32, #tpu.memory_space<smem>>
    %c2 = arith.constant 2 : index
    %2 = memref.load %arg1[%c2] : memref<4xf32, #tpu.memory_space<smem>>
    %c3 = arith.constant 3 : index
    %3 = memref.load %arg1[%c3] : memref<4xf32, #tpu.memory_space<smem>>
    %c0_0 = arith.constant 0 : index
    %c0_1 = arith.constant 0 : index
    %4 = vector.load %arg2[%c0_0, %c0_1] : memref<16x512xf32, #tpu.memory_space<vmem>>, vector<16x512xf32>
    %5 = tpu.iota {dimensions = array<i32: 1>} : vector<1x512xi32>
    %c1_i32 = arith.constant 1 : i32
    %6 = vector.broadcast %c1_i32 : i32 to vector<1x512xi32>
    %7 = arith.andi %5, %6 : vector<1x512xi32>
    %c0_i32 = arith.constant 0 : i32
    %8 = vector.broadcast %c0_i32 : i32 to vector<1x512xi32>
    %9 = arith.cmpi eq, %7, %8 : vector<1x512xi32>
    %c511_i32 = arith.constant 511 : i32
    %10 = tpu.dynamic_rotate %4 by %c511_i32 dim 1 : vector<16x512xf32>, i32 -> vector<16x512xf32>
    %c1_i32_2 = arith.constant 1 : i32
    %11 = tpu.dynamic_rotate %4 by %c1_i32_2 dim 1 : vector<16x512xf32>, i32 -> vector<16x512xf32>
    %12 = vector.shape_cast %9 : vector<1x512xi1> to vector<1x512xi1>
    %13 = vector.broadcast %12 : vector<1x512xi1> to vector<16x512xi1>
    %14 = arith.select %13, %10, %11 : vector<16x512xi1>, vector<16x512xf32>
    %cst = arith.constant 0.000000e+00 : f32
    %15 = arith.subf %cst, %1 : f32
    %16 = vector.broadcast %15 : f32 to vector<1x512xf32>
    %17 = vector.broadcast %1 : f32 to vector<1x512xf32>
    %18 = arith.select %9, %16, %17 : vector<1x512xi1>, vector<1x512xf32>
    %19 = vector.broadcast %2 : f32 to vector<1x512xf32>
    %20 = vector.broadcast %3 : f32 to vector<1x512xf32>
    %21 = arith.select %9, %19, %20 : vector<1x512xi1>, vector<1x512xf32>
    %22 = vector.broadcast %0 : f32 to vector<16x512xf32>
    %23 = arith.mulf %22, %4 : vector<16x512xf32>
    %24 = vector.broadcast %18 : vector<1x512xf32> to vector<16x512xf32>
    %25 = arith.mulf %24, %14 : vector<16x512xf32>
    %26 = arith.addf %23, %25 : vector<16x512xf32>
    %27 = vector.broadcast %21 : vector<1x512xf32> to vector<16x512xf32>
    %28 = arith.addf %26, %27 : vector<16x512xf32>
    %c0_3 = arith.constant 0 : index
    %c0_4 = arith.constant 0 : index
    %29 = vector.load %arg3[%c0_3, %c0_4] : memref<16x512xf32, #tpu.memory_space<vmem>>, vector<16x512xf32>
    tpu.vector_store %arg3[%c0_3, %c0_4], %28 {strides = array<i32>} : memref<16x512xf32, #tpu.memory_space<vmem>>, vector<16x512xf32>,
    return
  }
  func.func @transform_0(%arg0: i32) -> i32 {
    %c0_i32 = arith.constant 0 : i32
    %c0_i32_0 = arith.constant 0 : i32
    return %c0_i32 : i32
  }
  func.func @transform_1(%arg0: i32) -> (i32, i32) {
    %c0_i32 = arith.constant 0 : i32
    %c0_i32_0 = arith.constant 0 : i32
    return %arg0, %c0_i32 : i32, i32
  }
  func.func @transform_2(%arg0: i32) -> (i32, i32) {
    %c0_i32 = arith.constant 0 : i32
    %c0_i32_0 = arith.constant 0 : i32
    return %arg0, %c0_i32 : i32, i32
  }
}

</mosaic_0001>

<bundles_post_ra>
// kernel: tpu_custom_call.1
= control target key start
LH: loop header
LB: loop body
LE: loop exit
PB: predicated region body
PF: predicated region fallthrough
CT: control target
= control target key end

     0   :  { %7 = vsyncpa [#allocation5], 0  ;;  %s989_s0 = inlined_call_operand.hbm [shape: f32[4], index: 0, kind: input, shape index: {}]   ;;  %s990_s1 = inlined_call_operand.hbm [shape: f32[32,512], index: 1, kind: input, shape index: {}]   ;;  %s991_s2 = inlined_call_operand.hbm [shape: f32[32,512], index: 2, kind: output, shape index: {}]  }
   0x1   :  { %8 = vsyncpa [#allocation3], 0 }
   0x2   :  { %10 = vsyncpa [#allocation3 + $0x1], 0 }
   0x3   :  { %11 = vsyncpa [#allocation4], 0 }
   0x4   :  { %13 = vsyncpa [#allocation4 + $0x1], 0  ;;  %s649_s9 = smov 0   ;;  %s651_s10 = smov 0  }
   0x5   :  { %s653_s11 = smov 0   ;;  %s655_s12 = smov 0  }
   0x6 LB: > { %s670_s13 = sadd.s32 4294967295, %s623_s12   ;;  %s422_s14 = sadd.s32 4294967294, %s623_s12   ;;  %s623_s12 = sphi %s655_s12, %s1019_s12   ;;  %s619_s11 = sphi %s653_s11, %s1018_s11   ;;  %s615_s10 = sphi %s651_s10, %s1017_s10   ;;  %s611_s9 = sphi %s649_s9, %s1016_s9  }
   0x7   : > { %s674_s15 = sadd.s32 1, %s623_s12   ;;  %s47_s16 = sadd.s32 1, %s619_s11 }
   0x8   : > { %s44_s17 = ssub.s32 %s623_s12, %s674_s15  ;;  %p54_p0 = scmp.ne.s32.totalorder %s619_s11, %s615_s10 }
   0x9   : > { %p45_p1 = scmp.eq.s32.totalorder %s44_s17, 0  ;;  %p55_p2 = scmp.eq.s32.totalorder %s623_s12, 0 }
   0xa   : > { %p60_p3 = scmp.ne.s32.totalorder %s615_s10, %s611_s9  ;;  %p992_p4 = scmp.eq.s32.totalorder %s670_s13, 0 }
   0xb   : > { %s686_s18 = scalar_select %p45_p1, %s619_s11, %s47_s16  }
   0xc   : > { %p688_p5 = por %p55_p2, %p54_p0  ;;  %p694_p6 = por %p992_p4, %p60_p3 }
   0xd   : > { %p84_p7 = scmp.eq.s32.totalorder %s670_s13, 1  ;;  %p90_p8 = scmp.eq.s32.totalorder %s422_s14, 1 }
   0xe   : > { %s996_s20 = scalar_select %p694_p6, 1, 0 }
   0xf   : > { %p423_p9 = scmp.ge.s32.totalorder %s623_s12, 1  ;;  %p97_p10 = scmp.lt.s32.totalorder %s623_s12, 3 }
  0x10   : > { %p701_p11 = por %p84_p7, %p54_p0  ;;  %p705_p12 = por %p90_p8, %p60_p3 }
  0x11   : > { %p709_p13 = pnand %p423_p9, %p97_p10  ;;  %p468_p4 = scmp.lt.s32.totalorder %s623_s12, 2 }
  0x12   : > { %s997_s21 = scalar_select %p701_p11, 1, 0 }
  0x13   : > { %s998_s22 = scalar_select %p705_p12, 1, 0 }
  0x14   : > { %p455_p2 = pneg %p709_p13  ;;  %s119_s24 = sand.u32 1, %s619_s11  }
  0x15   : > { %s444_s25 = sshll.u32 %s623_s12, 10  ;;  %p1000_p6 = scmp.eq.s32.totalorder %s670_s13, 0 }
  0x16   : > { %p723_p7 = pnand %p468_p4, %p688_p5  ;;  %s426_s27 = sshll.u32 %s119_s24, 6 }
  0x17   : > { %p456_p0 = pnand %p455_p2, %p1000_p6  ;;  %s510_s30 = scalar_lea.hbm %s989_s0, 16 }
  0x18   : > { %p511_p3 = scmp.ne.s32.totalorder %s989_s0, %s510_s30  ;;  %p517_p6 = scmp.lt.u32.totalorder %s510_s30, %s989_s0 }
  0x19   : > { %p512_p8 = pneg %p456_p0 }
  0x1b   : > { %p513_p9 = pnand %p512_p8, %p511_p3 }
  0x1d   : > { %p514_p10 = pneg %p513_p9 }
  0x1f   : > { %p519_p4 = pnand %p517_p6, %p514_p10 }
  0x21   : > { %522 = shalt.err (!%p519_p4)
}
  0x22   : > { %s625_s7 = smov [#allocation2]   ;;  %s742_s19 = scalar_lea.hbm %s990_s1, %s444_s25 }
  0x23   : > { %458 = dma.hbm_to_smem (!%p456_p0), %s989_s0, 16, %s625_s7, [#allocation5]  }
  0x24   : > { %s123_s28 = scalar_lea.vmem [#allocation6], %s426_s27  ;;  %s746_s30 = scalar_lea.sflag [#allocation3], %s119_s24 }
  0x25   : > { %s131_s29 = sshll.u32 %s123_s28, 4  ;;  %s523_s3 = scalar_lea.hbm %s742_s19, 1024  ;;  %s744_s29 = int_to_ptr.vmem [resolvable:$true] %s131_s29 }
  0x26   : > { %p524_p5 = scmp.ne.s32.totalorder %s742_s19, %s523_s3  ;;  %p525_p2 = pneg %p723_p7 }
  0x27   : > { %s528_s5 = scalar_lea.hbm %s990_s1, 2048  ;;  %p529_p8 = scmp.lt.u32.totalorder %s742_s19, %s990_s1 }
  0x28   : > { %p526_p0 = pnand %p525_p2, %p524_p5  ;;  %p530_p9 = scmp.lt.u32.totalorder %s528_s5, %s523_s3 }
  0x29   : > { %p532_p6 = scmp.lt.u32.totalorder %s523_s3, %s742_s19 }
  0x2a   : > { %p527_p3 = pneg %p526_p0  ;;  %p531_p10 = por %p530_p9, %p529_p8 }
  0x2c   : > { %p533_p4 = por %p532_p6, %p531_p10 }
  0x2e   : > { %p534_p1 = pnand %p533_p4, %p527_p3 }
  0x30   : > { %537 = shalt.err (!%p534_p1)
}
  0x31   : > { %s538_s24 = scalar_lea.vmem %s744_s29, 1024  ;;  %s626_s27 = smov [#allocation6]  }
  0x32   : > { %p539_p5 = scmp.ne.s32.totalorder %s744_s29, %s538_s24  ;;  %s543_s8 = sshll.u32 %s626_s27, 4  ;;  %s544_s8 = int_to_ptr.vmem [resolvable:$false] %s543_s8 }
  0x33   : > { %s545_s14 = scalar_lea.vmem %s544_s8, 2048  ;;  %p546_p11 = scmp.lt.s32.totalorder %s744_s29, %s544_s8 }
  0x34   : > { %p541_p0 = pnand %p539_p5, %p525_p2  ;;  %p547_p8 = scmp.lt.s32.totalorder %s545_s14, %s538_s24 }
  0x36   : > { %p542_p12 = pneg %p541_p0  ;;  %p548_p9 = por %p547_p8, %p546_p11 }
  0x38   : > { %p549_p10 = pnand %p548_p9, %p542_p12 }
  0x3a   : > { %552 = shalt.err (!%p549_p10)
}
  0x3b   : > { %s627_s16 = smov 512   ;;  %s628_s17 = smov 32  }
  0x3c   : > { %462 = dma.hbm_to_vmem [thread:$0]  (!%p723_p7), %s742_s19, 1024, %s744_s29, %s746_s30, %s627_s16, %s627_s16, %s628_s17  }
  0x3d   : > { %143 = sbr.rel (%p709_p13) target bundleno = 245 (0xf5), region = 28  ;;  %p1002_p1 = scmp.eq.s32.totalorder (!%p709_p13), %s670_s13, 0 }
  0x44   : > { %598 = dma.done.wait (%p1002_p1), [#allocation5], 16   ;;  %p1003_p2 = pmov %p1002_p1 }
  0x45   : > { %s781_s28 = sand.u32 1, %s615_s10   ;;  %p1004_p11 = scmp.ne.s32.totalorder %s996_s20, 0 }
  0x46   : > { %600 = vsyncadd (%p1003_p2), [#allocation5], 4294967280  ;;  %s432_s3 = sshll.u32 %s781_s28, 6  ;;  %s150_s25 = scalar_lea.sflag [#allocation3], %s781_s28 }
  0x47   : > { %s153_s26 = scalar_lea.vmem [#allocation6], %s432_s3 }
  0x48   : > { %602 = dma.done.wait (%p1004_p11), %s150_s25, 1024  }
  0x49   : > { %604 = vsyncadd (%p1004_p11), %s150_s25, 4294966272 }
  0x4a   : > { %158 = sfence }
  0x4b   : > { %v182_v0 = vld [vmem:[%s153_s26 + $0x8] sm:$0xff]  ;;  %v181_v1 = vld [vmem:[%s153_s26] sm:$0xff]  ;;  %s629_s23 = smov 127   ;;  %v187_v4 = vld [vmem:[%s153_s26 + $0x30] sm:$0xff]  ;;  %s630_s20 = smov 1   ;;  %v189_v10 = vlaneseq }
  0x4c   : > { %206 = vrot.lane.b32.xlu1 %v182_v0, %s629_s23  ;;  %202 = vrot.lane.b32.xlu0 %v181_v1, %s629_s23  ;;  %v186_v2 = vld [vmem:[%s153_s26 + $0x28] sm:$0xff]  ;;  %v185_v3 = vld [vmem:[%s153_s26 + $0x20] sm:$0xff]  ;;  %s434_s19 = sld [smem:[#allocation2 + $0x1]]  ;;  %s177_s29 = sld [smem:[#allocation2]] }
  0x4d   : > { %v183_v5 = vld [vmem:[%s153_s26 + $0x10] sm:$0xff]  ;;  %v188_v6 = vld [vmem:[%s153_s26 + $0x38] sm:$0xff]  ;;  %v799_v13 = vand.u32 127, %v189_v10  ;;  %s435_s30 = sld [smem:[#allocation2 + $0x2]]  ;;  %s436_s4 = sld [smem:[#allocation2 + $0x3]] }
  0x4e   : > { %v184_v7 = vld [vmem:[%s153_s26 + $0x18] sm:$0xff]  ;;  %s901_s6 = scalar_lea.vmem [#allocation7], %s432_s3  ;;  %s446_s7 = sshll.u32 %s670_s13, 10 }
  0x4f   : > { %v191_v16 = vadd.s32 128, %v799_v13  ;;  %v192_v19 = vadd.s32 256, %v799_v13  ;;  %v193_v22 = vadd.s32 384, %v799_v13  ;;  %vm218_vm0 = vcmp.lt.s32.totalorder %v799_v13, 127  ;;  %s337_s24 = sshll.u32 %s901_s6, 4  ;;  %s939_s14 = scalar_lea.hbm %s991_s2, %s446_s7  ;;  %s941_s24 = int_to_ptr.vmem [resolvable:$true] %s337_s24 }
  0x50   : > { %208 = vrot.lane.b32.xlu1 %v186_v2, %s629_s23  ;;  %204 = vrot.lane.b32.xlu0 %v185_v3, %s629_s23  ;;  %vm243_vm1 = vcmp.lt.s32.totalorder %v799_v13, 1  ;;  %v194_v36 = vand.u32 1, %v799_v13  ;;  %s323_s13 = scalar_lea.sflag [#allocation4], %s781_s28  ;;  %s553_s16 = scalar_lea.vmem %s941_s24, 1024 }
  0x51   : > { %v195_v20 = vand.u32 1, %v191_v16  ;;  %v196_v25 = vand.u32 1, %v192_v19  ;;  %v197_v37 = vand.u32 1, %v193_v22  ;;  %p554_p12 = scmp.ne.s32.totalorder %s941_s24, %s553_s16  ;;  %p1013_p13 = scmp.ne.s32.totalorder %s997_s21, 0 }
  0x52   : > { %s268_s5 = ssub.f32 0.0, %s434_s19  ;;  %v281_v21 = vstv %s177_s29  ;;  %v270_v29 = vstv %s434_s19  ;;  %vm852_vm4 = vcmp.eq.s32.totalorder %v194_v36, 0  ;;  %s631_s17 = smov [#allocation7]  }
  0x53   : > { %v283_v26 = vmul.f32 %v281_v21, %v182_v0  ;;  %vm814_vm2 = vcmp.eq.s32.totalorder %v195_v20, 0  ;;  %v818_v30 = vmul.f32 %v281_v21, %v181_v1  ;;  %v287_v31 = vmul.f32 %v281_v21, %v186_v2  ;;  %p555_p7 = pnand %p554_p12, %p1013_p13  ;;  %s557_s3 = sshll.u32 %s631_s17, 4  ;;  %s558_s3 = int_to_ptr.vmem [resolvable:$false] %s557_s3 }
  0x54   : > { %212 = vrot.lane.b32.xlu1 %v187_v4, %s629_s23  ;;  %210 = vrot.lane.b32.xlu0 %v183_v5, %s629_s23  ;;  %v269_v28 = vstv %s268_s5  ;;  %v820_v32 = vmul.f32 %v281_v21, %v185_v3  ;;  %v288_v33 = vmul.f32 %v281_v21, %v187_v4  ;;  %v822_v34 = vstv %s435_s30  ;;  %s559_s25 = scalar_lea.vmem %s558_s3, 2048  ;;  %p560_p6 = scmp.lt.s32.totalorder %s941_s24, %s558_s3 }
  0x55   : > { %v276_v35 = vstv %s436_s4  ;;  %v284_v38 = vmul.f32 %v281_v21, %v183_v5  ;;  %v825_v39 = vmul.f32 %v281_v21, %v188_v6  ;;  %v272_v41 = vsel %vm814_vm2, %v269_v28, %v270_v29  ;;  %p556_p3 = pneg %p555_p7  ;;  %p561_p4 = scmp.lt.s32.totalorder %s559_s25, %s553_s16 }
  0x56   : > { %vm829_vm3 = vcmp.eq.s32.totalorder %v196_v25, 0  ;;  %v285_v48 = vmul.f32 %v281_v21, %v184_v7  ;;  %v278_v50 = vsel %vm814_vm2, %v822_v34, %v276_v35  ;;  %vm856_vm5 = vcmp.eq.s32.totalorder %v197_v37, 0 }
  0x57   : > { %v273_v59 = vsel %vm829_vm3, %v269_v28, %v270_v29  ;;  %v279_v60 = vsel %vm829_vm3, %v822_v34, %v276_v35  ;;  %p562_p5 = por %p561_p4, %p560_p6 }
  0x58   : > { %216 = vrot.lane.b32.xlu1 %v188_v6, %s629_s23  ;;  %214 = vrot.lane.b32.xlu0 %v184_v7, %s629_s23 }
  0x59   : > { %p563_p0 = pnand %p562_p5, %p556_p3 }
  0x5c   : > { %229 = vrot.lane.b32.xlu1 %v185_v3, %s630_s20  ;;  %227 = vrot.lane.b32.xlu0 %v181_v1, %s630_s20 }
  0x60   : > { %233 = vrot.lane.b32.xlu1 %v186_v2, %s630_s20  ;;  %231 = vrot.lane.b32.xlu0 %v182_v0, %s630_s20 }
  0x64   : > { %237 = vrot.lane.b32.xlu1 %v187_v4, %s630_s20  ;;  %235 = vrot.lane.b32.xlu0 %v183_v5, %s630_s20  ;;  %v271_v4 = vsel %vm852_vm4, %v269_v28, %v270_v29  ;;  %v274_v5 = vsel %vm856_vm5, %v269_v28, %v270_v29 }
  0x68   : > { %241 = vrot.lane.b32.xlu1 %v188_v6, %s630_s20  ;;  %239 = vrot.lane.b32.xlu0 %v184_v7, %s630_s20 }
  0xbe   : > { %v791_v8 = vpop.permute.xlu1 %206  ;;  %v793_v9 = vpop.permute.xlu0 %202 }
  0xc2   : > { %v795_v11 = vpop.permute.xlu1 %208  ;;  %v797_v12 = vpop.permute.xlu0 %204 }
  0xc3   : > { %v224_v16 = vsel %vm218_vm0, %v797_v12, %v795_v11 }
  0xc6   : > { %v213_v14 = vpop.permute.xlu1 %212  ;;  %v211_v15 = vpop.permute.xlu0 %210 }
  0xc7   : > { %v222_v44 = vsel %vm218_vm0, %v795_v11, %v213_v14  ;;  %v221_v45 = vsel %vm218_vm0, %v791_v8, %v211_v15 }
  0xca   : > { %v802_v17 = vpop.permute.xlu1 %216  ;;  %v804_v18 = vpop.permute.xlu0 %214 }
  0xcb   : > { %v220_v56 = vsel %vm218_vm0, %v213_v14, %v802_v17  ;;  %v219_v57 = vsel %vm218_vm0, %v211_v15, %v804_v18  ;;  %v223_v15 = vsel %vm218_vm0, %v793_v9, %v791_v8  ;;  %v226_v19 = vsel %vm218_vm0, %v802_v17, %v797_v12 }
  0xcc   : > { %v225_v20 = vsel %vm218_vm0, %v804_v18, %v793_v9 }
  0xce   : > { %v809_v23 = vpop.permute.xlu1 %229  ;;  %v811_v24 = vpop.permute.xlu0 %227 }
  0xd2   : > { %v234_v40 = vpop.permute.xlu1 %233  ;;  %v232_v42 = vpop.permute.xlu0 %231 }
  0xd3   : > { %v249_v46 = vsel %vm243_vm1, %v809_v23, %v234_v40  ;;  %v248_v47 = vsel %vm243_vm1, %v811_v24, %v232_v42 }
  0xd4   : > { %v265_v49 = vsel %vm814_vm2, %v222_v44, %v249_v46  ;;  %v261_v51 = vsel %vm814_vm2, %v221_v45, %v248_v47 }
  0xd5   : > { %v295_v52 = vmul.f32 %v272_v41, %v265_v49  ;;  %v291_v53 = vmul.f32 %v272_v41, %v261_v51 }
  0xd6   : > { %v238_v58 = vpop.permute.xlu1 %237  ;;  %v236_v61 = vpop.permute.xlu0 %235 }
  0xd7   : > { %v303_v62 = vadd.f32 %v295_v52, %v287_v31  ;;  %v299_v63 = vadd.f32 %v291_v53, %v283_v26  ;;  %v247_v0 = vsel %vm243_vm1, %v234_v40, %v238_v58  ;;  %v246_v1 = vsel %vm243_vm1, %v232_v42, %v236_v61 }
  0xd8   : > { %v266_v2 = vsel %vm829_vm3, %v220_v56, %v247_v0  ;;  %v262_v3 = vsel %vm829_vm3, %v219_v57, %v246_v1 }
  0xd9   : > { %v311_v6 = vadd.f32 %v303_v62, %v278_v50  ;;  %v307_v7 = vadd.f32 %v299_v63, %v278_v50  ;;  %v296_v10 = vmul.f32 %v273_v59, %v266_v2  ;;  %v292_v14 = vmul.f32 %v273_v59, %v262_v3 }
  0xda   : > { %v242_v21 = vpop.permute.xlu1 %241  ;;  %v240_v22 = vpop.permute.xlu0 %239 }
  0xdb   : > { %319 = vst [vmem:[%s901_s6 + $0x28] sm:$0xff] %v311_v6  ;;  %315 = vst [vmem:[%s901_s6 + $0x8] sm:$0xff] %v307_v7  ;;  %v304_v8 = vadd.f32 %v296_v10, %v288_v33  ;;  %v300_v11 = vadd.f32 %v292_v14, %v284_v38  ;;  %v245_v12 = vsel %vm243_vm1, %v238_v58, %v242_v21 }
  0xdc   : > { %v251_v9 = vsel %vm243_vm1, %v242_v21, %v809_v23  ;;  %v267_v18 = vsel %vm856_vm5, %v226_v19, %v245_v12  ;;  %v244_v25 = vsel %vm243_vm1, %v236_v61, %v240_v22  ;;  %v250_v26 = vsel %vm243_vm1, %v240_v22, %v811_v24 }
  0xdd   : > { %v264_v17 = vsel %vm852_vm4, %v224_v16, %v251_v9  ;;  %v312_v27 = vadd.f32 %v304_v8, %v279_v60  ;;  %v308_v28 = vadd.f32 %v300_v11, %v279_v60  ;;  %v297_v31 = vmul.f32 %v274_v5, %v267_v18 }
  0xde   : > { %v294_v29 = vmul.f32 %v271_v4, %v264_v17  ;;  %v277_v23 = vsel %vm852_vm4, %v822_v34, %v276_v35  ;;  %v280_v33 = vsel %vm856_vm5, %v822_v34, %v276_v35  ;;  %v260_v36 = vsel %vm852_vm4, %v223_v15, %v250_v26 }
  0xdf   : > { %v263_v13 = vsel %vm856_vm5, %v225_v20, %v244_v25  ;;  %320 = vst [vmem:[%s901_s6 + $0x30] sm:$0xff] %v312_v27  ;;  %316 = vst [vmem:[%s901_s6 + $0x10] sm:$0xff] %v308_v28  ;;  %v305_v37 = vadd.f32 %v297_v31, %v825_v39  ;;  %v290_v38 = vmul.f32 %v271_v4, %v260_v36 }
  0xe0   : > { %v302_v24 = vadd.f32 %v294_v29, %v820_v32  ;;  %v293_v40 = vmul.f32 %v274_v5, %v263_v13 }
  0xe1   : > { %v313_v35 = vadd.f32 %v305_v37, %v280_v33  ;;  %v298_v41 = vadd.f32 %v290_v38, %v818_v30 }
  0xe2   : > { %v310_v34 = vadd.f32 %v302_v24, %v277_v23  ;;  %v301_v42 = vadd.f32 %v293_v40, %v285_v48 }
  0xe3   : > { %321 = vst [vmem:[%s901_s6 + $0x38] sm:$0xff] %v313_v35  ;;  %v306_v32 = vadd.f32 %v298_v41, %v277_v23 }
  0xe4   : > { %318 = vst [vmem:[%s901_s6 + $0x20] sm:$0xff] %v310_v34  ;;  %v309_v39 = vadd.f32 %v301_v42, %v280_v33 }
  0xe5   : > { %314 = vst [vmem:[%s901_s6] sm:$0xff] %v306_v32 }
  0xe6   : > { %317 = vst [vmem:[%s901_s6 + $0x18] sm:$0xff] %v309_v39 }
  0xe7   : > { %566 = shalt.err (!%p563_p0)
}
  0xe8   : > { %s567_s26 = scalar_lea.hbm %s939_s14, 1024  ;;  %s571_s19 = scalar_lea.hbm %s991_s2, 2048 }
  0xe9   : > { %p568_p8 = scmp.ne.s32.totalorder %s939_s14, %s567_s26  ;;  %p572_p1 = scmp.lt.u32.totalorder %s939_s14, %s991_s2 }
  0xea   : > { %p573_p2 = scmp.lt.u32.totalorder %s571_s19, %s567_s26  ;;  %p575_p12 = scmp.lt.u32.totalorder %s567_s26, %s939_s14 }
  0xeb   : > { %p569_p9 = pnand %p568_p8, %p1013_p13 }
  0xec   : > { %p574_p11 = por %p573_p2, %p572_p1 }
  0xed   : > { %p570_p10 = pneg %p569_p9 }
  0xee   : > { %p576_p7 = por %p575_p12, %p574_p11 }
  0xf0   : > { %p577_p3 = pnand %p576_p7, %p570_p10 }
  0xf2   : > { %580 = shalt.err (!%p577_p3)
}
  0xf3   : > { %s632_s4 = smov 512   ;;  %s633_s5 = smov 32  }
  0xf4   : > { %453 = dma.vmem_to_hbm [thread:$0]  (%p1013_p13), %s941_s24, 1024, %s939_s14, %s323_s13, %s632_s4, %s632_s4, %s633_s5  }
  0xf5 PF: > { %s352_s6 = sand.u32 1, %s611_s9   ;;  %p1014_p6 = scmp.ne.s32.totalorder %s998_s22, 0 }
  0xf6   : > { %p1015_p4 = scmp.ge.s32.totalorder %s623_s12, 2  ;;  %s353_s7 = scalar_lea.sflag [#allocation4], %s352_s6 }
  0xf8   : > { %p464_p5 = pnand %p1015_p4, %p1014_p6 }
  0xfa   : > { %606 = dma.done.wait (!%p464_p5), %s353_s7, 1024  }
  0xfb   : > { %608 = vsyncadd (!%p464_p5), %s353_s7, 4294966272  ;;  %p16_p0 = scmp.ge.s32.totalorder %s674_s15, 4   ;;  %s1016_s9 = smov %s615_s10 }
  0xfc   : > { %s1017_s10 = smov %s619_s11  ;;  %s1018_s11 = smov %s686_s18 }
  0xfd   : > { %s1019_s12 = smov %s674_s15  ;;  %18 = sbr.rel (!%p16_p0) target bundleno = 6 (0x6), region = 78 }
 0x104   :  { %358 = vsyncpa [#allocation3], 1 }
 0x105   :  { %360 = vsyncpa [#allocation3 + $0x1], 1 }
 0x106   :  { %361 = vsyncpa [#allocation4], 1 }
 0x107   :  { %363 = vsyncpa [#allocation4 + $0x1], 1 }
 0x108   :  { %364 = vsyncpa [#allocation5], 1 }
 0x109   :  { %366 = vsyncpa [#allocation5 + $0x1], 1 }

</bundles_post_ra>
